<compile_context>
chip_gen: v5e
topology: v5e:2x2
jax: 0.10.0
libtpu: 0.0.40
codegen_flags: <defaults>
</compile_context>

<pallas_src>
import functools

import jax
import jax.numpy as jnp
from jax.experimental import pallas as pl
from jax.experimental.pallas import tpu as pltpu


def _round_up(n: int, m: int) -> int:
    return ((n + m - 1) // m) * m


def _mlp_kernel(x_ref, w1_ref, w2_ref, o_ref):
    # x_ref : (block_b, E_pad)   -- last column is the all-ones bias column
    # w1_ref: (E_pad, C_pad)     -- row E holds b1 (and the "1" feeding layer-2 bias)
    # w2_ref: (C_pad, block_s)   -- row C holds b2
    # First linear (+ folded bias) and ReLU.
    h = jnp.dot(x_ref[...], w1_ref[...], preferred_element_type=jnp.float32)
    h = jnp.maximum(h, 0.0)
    # Second linear (+ folded bias).  f32 MXU accumulation.
    # NOTE: if weights are bf16 this downcasts activations (inference fast path).
    out = jnp.dot(h.astype(w2_ref.dtype), w2_ref[...],
                  preferred_element_type=jnp.float32)
    o_ref[...] = out.astype(o_ref.dtype)


@functools.partial(jax.jit, static_argnames=("block_b", "block_s", "weight_dtype"))
def speaker_embedding_classifier(x, w1, b1, w2, b2, *,
                                 block_b=None, block_s=None, weight_dtype=None):
    """x: (B, E).  w1: (E, C), b1: (C,), w2: (C, S), b2: (S,).  Returns (B, S)."""
    B, E = x.shape
    C = w1.shape[1]
    S = w2.shape[1]
    wdt = jnp.dtype(weight_dtype) if weight_dtype is not None else jnp.dtype(w1.dtype)

    # ---- lane-dense padded dims (+1 row/col for the folded biases) ----
    E_pad = _round_up(E + 1, 128)
    C_pad = _round_up(C + 1, 128)
    S_pad = _round_up(S, 128)

    # ---- tile sizes ----
    if block_b is None:
        block_b = min(512, _round_up(B, 8))
    block_b = _round_up(block_b, 8)
    B_pad = _round_up(B, block_b)

    if block_s is None:
        block_s = S_pad if S_pad <= 2048 else 1024
    block_s = _round_up(block_s, 128)
    S_pad = _round_up(S_pad, block_s)

    # ---- build padded / bias-augmented operands (wrapper-side, cheap XLA ops) ----
    x_pad = jnp.zeros((B_pad, E_pad), dtype=x.dtype)
    x_pad = x_pad.at[:B, :E].set(x)
    x_pad = x_pad.at[:, E].set(jnp.asarray(1.0, x.dtype))       # bias column for layer 1

    w1_pad = jnp.zeros((E_pad, C_pad), dtype=wdt)
    w1_pad = w1_pad.at[:E, :C].set(w1.astype(wdt))
    w1_pad = w1_pad.at[E, :C].set(b1.astype(wdt))               # folded b1
    w1_pad = w1_pad.at[E, C].set(jnp.asarray(1.0, wdt))         # makes h[:, C] == 1

    w2_pad = jnp.zeros((C_pad, S_pad), dtype=wdt)
    w2_pad = w2_pad.at[:C, :S].set(w2.astype(wdt))
    w2_pad = w2_pad.at[C, :S].set(b2.astype(wdt))               # folded b2

    # ---- VMEM budget (double-buffered tiles + resident W1), clamped for v7x ----
    wb = jnp.dtype(wdt).itemsize
    xb = jnp.dtype(x.dtype).itemsize
    tile_bytes = (block_b * E_pad * xb        # x tile
                  + E_pad * C_pad * wb        # W1 (resident)
                  + C_pad * block_s * wb      # W2 tile
                  + block_b * block_s * xb)   # out tile
    vmem_limit = int(min(64 << 20, max(32 << 20, 2 * tile_bytes + (2 << 20))))

    grid = (B_pad // block_b, S_pad // block_s)

    out_pad = pl.pallas_call(
        _mlp_kernel,
        out_shape=jax.ShapeDtypeStruct((B_pad, S_pad), x.dtype),
        grid=grid,
        in_specs=[
            pl.BlockSpec((block_b, E_pad), lambda i, j: (i, 0)),   # x tile
            pl.BlockSpec((E_pad, C_pad), lambda i, j: (0, 0)),     # W1 (resident)
            pl.BlockSpec((C_pad, block_s), lambda i, j: (0, j)),   # W2 tile over S
        ],
        out_specs=pl.BlockSpec((block_b, block_s), lambda i, j: (i, j)),
        compiler_params=pltpu.CompilerParams(
            dimension_semantics=("parallel", "parallel"),
            vmem_limit_bytes=vmem_limit,
        ),
    )(x_pad, w1_pad, w2_pad)

    # Slice off batch / speaker padding (padded logit columns must never reach
    # a downstream softmax/argmax).
    return out_pad[:B, :S]


def _reference(x, w1, b1, w2, b2):
    h = jnp.maximum(x @ w1 + b1, 0.0)
    return h @ w2 + b2


if __name__ == "__main__":
    # Small shapes consistent with the module's forward.
    batch = 8
    embedding_dim = 32
    classifier_dim = 64
    num_speakers = 16

    key = jax.random.PRNGKey(0)
    kx, kw1, kb1, kw2, kb2 = jax.random.split(key, 5)

    # PyTorch Linear stores weight as (out, in); we pass the transposed
    # (in, out) layout the kernel consumes.
    x = jax.random.normal(kx, (batch, embedding_dim), dtype=jnp.float32)
    w1 = jax.random.normal(kw1, (embedding_dim, classifier_dim),
                           dtype=jnp.float32) * 0.1
    b1 = jax.random.normal(kb1, (classifier_dim,), dtype=jnp.float32) * 0.1
    w2 = jax.random.normal(kw2, (classifier_dim, num_speakers),
                           dtype=jnp.float32) * 0.1
    b2 = jax.random.normal(kb2, (num_speakers,), dtype=jnp.float32) * 0.1

    out = speaker_embedding_classifier(x, w1, b1, w2, b2)
    out = jax.block_until_ready(out)

    ref = _reference(x, w1, b1, w2, b2)
    assert out.shape == (batch, num_speakers)
    assert jnp.allclose(out, ref, atol=1e-4, rtol=1e-4), "mismatch vs reference"

    # TODO(synk): for bf16-weight inference (v6e/v7x fast path) pass
    # weight_dtype=jnp.bfloat16; activations are downcast before the 2nd matmul,
    # which diverges slightly from the fp32 PyTorch reference.

    print("KERNEL_OK")
</pallas_src>

<mosaic_0001>
module attributes {stable_mosaic.version = 11 : i64} {
  func.func @_mlp_kernel(%arg0: i32, %arg1: i32, %arg2: memref<8x128xf32, #tpu.memory_space<vmem>>, %arg3: memref<128x128xf32, #tpu.memory_space<vmem>>, %arg4: memref<128x128xf32, #tpu.memory_space<vmem>>, %arg5: memref<8x128xf32, #tpu.memory_space<vmem>>) attributes {dimension_semantics = [#tpu.dimension_semantics<parallel>, #tpu.dimension_semantics<parallel>], iteration_bounds = array<i64: 1, 1>, scalar_prefetch = 0 : i64, scratch_operands = 0 : i64, tpu.core_type = #tpu.core_type<tc>, window_params = [{transform_indices = @transform_0, window_bounds = array<i64: 8, 128>}, {pipeline_mode = #tpu.pipeline_mode<synchronous>, transform_indices = @transform_1, window_bounds = array<i64: 128, 128>}, {transform_indices = @transform_2, window_bounds = array<i64: 128, 128>}, {transform_indices = @transform_3, window_bounds = array<i64: 8, 128>}]} {
    %c0 = arith.constant 0 : index
    %c0_0 = arith.constant 0 : index
    %0 = vector.load %arg2[%c0, %c0_0] : memref<8x128xf32, #tpu.memory_space<vmem>>, vector<8x128xf32>
    %c0_1 = arith.constant 0 : index
    %c0_2 = arith.constant 0 : index
    %1 = vector.load %arg3[%c0_1, %c0_2] : memref<128x128xf32, #tpu.memory_space<vmem>>, vector<128x128xf32>
    %cst = arith.constant dense<0.000000e+00> : vector<8x128xf32>
    %2 = tpu.matmul %0, %1, %cst {dimension_numbers = #tpu.dot_dimension_numbers<[1], [0], [0], [1], [0, 0, 1, 1], [], []>} : vector<8x128xf32>, vector<128x128xf32>, vector<8x128xf32> -> vector<8x128xf32>
    %cst_3 = arith.constant 0.000000e+00 : f32
    %3 = vector.broadcast %cst_3 : f32 to vector<8x128xf32>
    %4 = arith.maximumf %2, %3 : vector<8x128xf32>
    %c0_4 = arith.constant 0 : index
    %c0_5 = arith.constant 0 : index
    %5 = vector.load %arg4[%c0_4, %c0_5] : memref<128x128xf32, #tpu.memory_space<vmem>>, vector<128x128xf32>
    %cst_6 = arith.constant dense<0.000000e+00> : vector<8x128xf32>
    %6 = tpu.matmul %4, %5, %cst_6 {dimension_numbers = #tpu.dot_dimension_numbers<[1], [0], [0], [1], [0, 0, 1, 1], [], []>} : vector<8x128xf32>, vector<128x128xf32>, vector<8x128xf32> -> vector<8x128xf32>
    %c0_7 = arith.constant 0 : index
    %c0_8 = arith.constant 0 : index
    %7 = vector.load %arg5[%c0_7, %c0_8] : memref<8x128xf32, #tpu.memory_space<vmem>>, vector<8x128xf32>
    tpu.vector_store %arg5[%c0_7, %c0_8], %6 {strides = array<i32>} : memref<8x128xf32, #tpu.memory_space<vmem>>, vector<8x128xf32>,
    return
  }
  func.func @transform_0(%arg0: i32, %arg1: i32) -> (i32, i32) {
    %c0_i32 = arith.constant 0 : i32
    %c0_i32_0 = arith.constant 0 : i32
    return %arg0, %c0_i32 : i32, i32
  }
  func.func @transform_1(%arg0: i32, %arg1: i32) -> (i32, i32) {
    %c0_i32 = arith.constant 0 : i32
    %c0_i32_0 = arith.constant 0 : i32
    %c0_i32_1 = arith.constant 0 : i32
    return %c0_i32, %c0_i32_0 : i32, i32
  }
  func.func @transform_2(%arg0: i32, %arg1: i32) -> (i32, i32) {
    %c0_i32 = arith.constant 0 : i32
    %c0_i32_0 = arith.constant 0 : i32
    return %c0_i32, %arg1 : i32, i32
  }
  func.func @transform_3(%arg0: i32, %arg1: i32) -> (i32, i32) {
    %c0_i32 = arith.constant 0 : i32
    return %arg0, %arg1 : i32, i32
  }
}

</mosaic_0001>

<bundles_post_ra>
// kernel: speaker_embedding_classifier.1
= control target key start
LH: loop header
LB: loop body
LE: loop exit
PB: predicated region body
PF: predicated region fallthrough
CT: control target
= control target key end

     0   :  { %s256_s0 = inlined_call_operand.vmem [shape: f32[8,128], index: 0, kind: input, shape index: {}]   ;;  %s257_s1 = inlined_call_operand.vmem [shape: f32[128,128], index: 1, kind: input, shape index: {}]   ;;  %s258_s2 = inlined_call_operand.vmem [shape: f32[128,128], index: 2, kind: input, shape index: {}]   ;;  %s259_s3 = inlined_call_operand.hbm [shape: f32[8,128], index: 3, kind: output, shape index: {}]  }
   0x1   :  { %v31_v0 = vld [vmem:[%s257_s1 + $0x78] sm:$0xff]  ;;  %v30_v1 = vld [vmem:[%s257_s1 + $0x70] sm:$0xff]  ;;  %v29_v2 = vld [vmem:[%s257_s1 + $0x68] sm:$0xff] }
   0x2   :  { %32 = vmatpush.msra.mxu0 %v31_v0  ;;  %v28_v3 = vld [vmem:[%s257_s1 + $0x60] sm:$0xff]  ;;  %v68_v4 = vld [vmem:[%s258_s2 + $0x78] sm:$0xff]  ;;  %v67_v6 = vld [vmem:[%s258_s2 + $0x70] sm:$0xff] }
   0x3   :  { %v27_v5 = vld [vmem:[%s257_s1 + $0x58] sm:$0xff]  ;;  %69 = vmatpush.msra.mxu1 %v68_v4  ;;  %v66_v7 = vld [vmem:[%s258_s2 + $0x68] sm:$0xff]  ;;  %v26_v8 = vld [vmem:[%s257_s1 + $0x50] sm:$0xff] }
   0x4   :  { %33 = vmatpush.msra.mxu0 %v30_v1  ;;  %v65_v9 = vld [vmem:[%s258_s2 + $0x60] sm:$0xff]  ;;  %v25_v10 = vld [vmem:[%s257_s1 + $0x48] sm:$0xff] }
   0x5   :  { %70 = vmatpush.msra.mxu1 %v67_v6 }
   0x6   :  { %34 = vmatpush.msra.mxu0 %v29_v2 }
   0x7   :  { %71 = vmatpush.msra.mxu1 %v66_v7 }
   0x8   :  { %35 = vmatpush.msra.mxu0 %v28_v3 }
   0xa   :  { %36 = vmatpush.msra.mxu0 %v27_v5 }
   0xb   :  { %8 = vsyncpa [#allocation3], 0  ;;  %v64_v11 = vld [vmem:[%s258_s2 + $0x58] sm:$0xff]  ;;  %v24_v12 = vld [vmem:[%s257_s1 + $0x40] sm:$0xff]  ;;  %72 = vmatpush.msra.mxu1 %v65_v9  ;;  %s97_s26 = sshll.u32 %s259_s3, 4  ;;  %s98_s26 = int_to_ptr.hbm [resolvable:$true] %s97_s26 }
   0xc   :  { %37 = vmatpush.msra.mxu0 %v26_v8  ;;  %v63_v13 = vld [vmem:[%s258_s2 + $0x50] sm:$0xff]  ;;  %v23_v14 = vld [vmem:[%s257_s1 + $0x38] sm:$0xff]  ;;  %v62_v15 = vld [vmem:[%s258_s2 + $0x48] sm:$0xff] }
   0xd   :  { %73 = vmatpush.msra.mxu1 %v64_v11  ;;  %v22_v16 = vld [vmem:[%s257_s1 + $0x30] sm:$0xff]  ;;  %v61_v17 = vld [vmem:[%s258_s2 + $0x40] sm:$0xff]  ;;  %v21_v18 = vld [vmem:[%s257_s1 + $0x28] sm:$0xff] }
   0xe   :  { %38 = vmatpush.msra.mxu0 %v25_v10  ;;  %v60_v19 = vld [vmem:[%s258_s2 + $0x38] sm:$0xff]  ;;  %v20_v20 = vld [vmem:[%s257_s1 + $0x20] sm:$0xff]  ;;  %v59_v21 = vld [vmem:[%s258_s2 + $0x30] sm:$0xff] }
   0xf   :  { %74 = vmatpush.msra.mxu1 %v63_v13  ;;  %v19_v22 = vld [vmem:[%s257_s1 + $0x18] sm:$0xff]  ;;  %v58_v23 = vld [vmem:[%s258_s2 + $0x28] sm:$0xff]  ;;  %v18_v24 = vld [vmem:[%s257_s1 + $0x10] sm:$0xff] }
  0x10   :  { %39 = vmatpush.msra.mxu0 %v24_v12  ;;  %v57_v25 = vld [vmem:[%s258_s2 + $0x20] sm:$0xff]  ;;  %v17_v26 = vld [vmem:[%s257_s1 + $0x8] sm:$0xff]  ;;  %v56_v27 = vld [vmem:[%s258_s2 + $0x18] sm:$0xff] }
  0x11   :  { %75 = vmatpush.msra.mxu1 %v62_v15  ;;  %v16_v28 = vld [vmem:[%s257_s1] sm:$0xff]  ;;  %v55_v30 = vld [vmem:[%s258_s2 + $0x10] sm:$0xff]  ;;  %v54_v31 = vld [vmem:[%s258_s2 + $0x8] sm:$0xff] }
  0x12   :  { %40 = vmatpush.msra.mxu0 %v23_v14  ;;  %v15_v29 = vld [vmem:[%s256_s0] sm:$0xff]  ;;  %s133_s0 = smov [#allocation2]  }
  0x13   :  { %76 = vmatpush.msra.mxu1 %v61_v17  ;;  %v53_v32 = vld [vmem:[%s258_s2] sm:$0xff]  ;;  %s95_s23 = sshll.u32 %s133_s0, 4  ;;  %s96_s23 = int_to_ptr.vmem [resolvable:$true] %s95_s23 }
  0x14   :  { %41 = vmatpush.msra.mxu0 %v22_v16 }
  0x15   :  { %77 = vmatpush.msra.mxu1 %v60_v19 }
  0x16   :  { %42 = vmatpush.msra.mxu0 %v21_v18 }
  0x17   :  { %78 = vmatpush.msra.mxu1 %v59_v21 }
  0x18   :  { %43 = vmatpush.msra.mxu0 %v20_v20 }
  0x19   :  { %79 = vmatpush.msra.mxu1 %v58_v23 }
  0x1a   :  { %44 = vmatpush.msra.mxu0 %v19_v22 }
  0x1b   :  { %80 = vmatpush.msra.mxu1 %v57_v25 }
  0x1c   :  { %45 = vmatpush.msra.mxu0 %v18_v24 }
  0x1d   :  { %81 = vmatpush.msra.mxu1 %v56_v27 }
  0x1e   :  { %46 = vmatpush.msra.mxu0 %v17_v26 }
  0x1f   :  { %82 = vmatpush.msra.mxu1 %v55_v30 }
  0x20   :  { %47 = vmatpush.msra.mxu0 %v16_v28 }
  0x21   :  { %48 = vmatmul.f32.vlgmr.msra.gmra.mxu0 %v15_v29  ;;  %83 = vmatpush.msra.mxu1 %v54_v31 }
  0x23   :  { %84 = vmatpush.msra.mxu1 %v53_v32 }
  0x9e   :  { %v49_v33 = vpop.f32.mrf.mxu0 }
  0x9f   :  { %v52_v34 = vmax.f32 %v49_v33, 0.0 }
  0xa1   :  { %85 = vmatmul.f32.vlgmr.msra.gmra.mxu1 %v52_v34 }
 0x11e   :  { %v86_v35 = vpop.f32.mrf.mxu1 }
 0x11f   :  { %89 = vst [vmem:[#allocation2] sm:$0xff] %v86_v35 }
 0x120   :  { %100 = dma.vmem_to_hbm [thread:$0]  %s96_s23, 128, %s98_s26, [#allocation3]  }
 0x121   :  { %131 = dma.done.wait [#allocation3], 128  }
 0x122   :  { %132 = vsyncadd [#allocation3], 4294967168 }
 0x123   :  { %105 = vsyncpa [#allocation3], 1 }

</bundles_post_ra>
